<compile_context>
chip_gen: v5e
topology: v5e:2x2
jax: 0.10.0
libtpu: 0.0.40
codegen_flags: <defaults>
</compile_context>

<pallas_src>
import functools

import jax
import jax.numpy as jnp
from jax.experimental import pallas as pl
from jax.experimental.pallas import tpu as pltpu

LANE = 128     # lane width (last-dim tiling unit)
SUBLANE = 8    # sublane width (second-to-last-dim tiling unit)


def _round_up(x, m):
    return (x + m - 1) // m * m


def actor_kernel(x_ref, w1_ref, b1_ref, w2_ref, b2_ref, w3_ref, b3_ref,
                 mask_ref, o_ref):
    x = x_ref[...]                                              # [TB, S] bf16

    # fc1 + ReLU (bf16 operands, f32 MXU accumulation)
    h = jnp.dot(x, w1_ref[...], preferred_element_type=jnp.float32) + b1_ref[...]
    h = jnp.maximum(h, 0.0)                                     # [TB, H_p] f32

    # fc2 + ReLU
    h = jnp.dot(h.astype(jnp.bfloat16), w2_ref[...],
                preferred_element_type=jnp.float32) + b2_ref[...]
    h = jnp.maximum(h, 0.0)                                     # [TB, H_p] f32

    # fc3 + ReLU
    logits = jnp.dot(h.astype(jnp.bfloat16), w3_ref[...],
                     preferred_element_type=jnp.float32) + b3_ref[...]
    logits = jnp.maximum(logits, 0.0)                           # [TB, A_p] f32

    # Precomputed additive mask: 0 on real action lanes, -inf on padded lanes,
    # so softmax normalizes only over the true action_dim.
    logits = logits + mask_ref[...]

    # Numerically stable softmax with an exact divide (rows sum to 1).
    m = jnp.max(logits, axis=-1, keepdims=True)
    e = jnp.exp(logits - m)
    denom = jnp.sum(e, axis=-1, keepdims=True)
    o_ref[...] = (e / denom).astype(o_ref.dtype)


def prepare_actor_params(params):
    """One-time padding/casting of weights (bf16, [in, out]) and biases (f32).

    Hoisted out of the per-call path so the pad/cast HLOs don't run (and hit
    HBM) on every forward call.
    """
    w1, b1 = params["w1"], params["b1"]
    w2, b2 = params["w2"], params["b2"]
    w3, b3 = params["w3"], params["b3"]

    S = w1.shape[0]
    H = w1.shape[1]
    A = w3.shape[1]
    H_p = _round_up(H, LANE)
    A_p = _round_up(A, LANE)

    def pad_w(w, rows, cols):
        return (jnp.zeros((rows, cols), jnp.bfloat16)
                .at[: w.shape[0], : w.shape[1]].set(w.astype(jnp.bfloat16)))

    def pad_b(b, cols):
        return (jnp.zeros((1, cols), jnp.float32)
                .at[0, : b.shape[0]].set(b.astype(jnp.float32)))

    # Additive softmax mask over the padded action lanes.
    col = jnp.arange(A_p)[None, :]
    mask = jnp.where(col < A, 0.0, -jnp.inf).astype(jnp.float32)

    return {
        "state_dim": S, "hidden_dim": H, "action_dim": A,
        "H_p": H_p, "A_p": A_p,
        "w1": pad_w(w1, S, H_p),   "b1": pad_b(b1, H_p),
        "w2": pad_w(w2, H_p, H_p), "b2": pad_b(b2, H_p),
        "w3": pad_w(w3, H_p, A_p), "b3": pad_b(b3, A_p),
        "mask": mask,
    }


def actor_forward(state, prepared, *, batch_tile=1024, out_dtype=jnp.float32):
    """state: [B, state_dim] float; prepared: output of prepare_actor_params."""
    B, S = state.shape
    assert S == prepared["state_dim"], "state_dim mismatch"
    A = prepared["action_dim"]
    H_p, A_p = prepared["H_p"], prepared["A_p"]

    # Batch tiling: large tiles amortize per-step overhead, but cap so the grid
    # has >=2 steps when possible (keeps both v7x TensorCores busy).
    B8 = _round_up(max(B, 1), SUBLANE)
    TB = min(_round_up(batch_tile, SUBLANE),
             _round_up(pl.cdiv(B8, 2), SUBLANE))
    TB = max(TB, SUBLANE)
    B_p = _round_up(B, TB)

    # Feed activations in bf16, batch-padded only (feature dim kept at true S
    # via the full-array-dim BlockSpec exception -> no 128-lane f32 inflation).
    x = state.astype(jnp.bfloat16)
    if B_p != B:
        x = jnp.zeros((B_p, S), jnp.bfloat16).at[:B, :].set(x)

    grid = (B_p // TB,)

    flops = 2 * B_p * (S * H_p + H_p * H_p + H_p * A_p)
    bytes_accessed = (
        B_p * S * 2                                             # x (bf16)
        + (prepared["w1"].size + prepared["w2"].size + prepared["w3"].size) * 2
        + (prepared["b1"].size + prepared["b2"].size + prepared["b3"].size
           + prepared["mask"].size) * 4
        + B_p * A_p * jnp.dtype(out_dtype).itemsize)            # output
    cost = pl.CostEstimate(flops=flops,
                           transcendentals=B_p * A_p,
                           bytes_accessed=bytes_accessed)

    out = pl.pallas_call(
        actor_kernel,
        out_shape=jax.ShapeDtypeStruct((B_p, A_p), out_dtype),
        grid=grid,
        in_specs=[
            pl.BlockSpec((TB, S), lambda i: (i, 0)),       # activations: batch-tiled, true S
            pl.BlockSpec((S, H_p), lambda i: (0, 0)),      # weights/biases: VMEM-resident
            pl.BlockSpec((1, H_p), lambda i: (0, 0)),
            pl.BlockSpec((H_p, H_p), lambda i: (0, 0)),
            pl.BlockSpec((1, H_p), lambda i: (0, 0)),
            pl.BlockSpec((H_p, A_p), lambda i: (0, 0)),
            pl.BlockSpec((1, A_p), lambda i: (0, 0)),
            pl.BlockSpec((1, A_p), lambda i: (0, 0)),      # additive softmax mask
        ],
        out_specs=pl.BlockSpec((TB, A_p), lambda i: (i, 0)),   # lane-dense output stores
        compiler_params=pltpu.CompilerParams(
            dimension_semantics=("parallel",),
        ),
        cost_estimate=cost,
    )(x, prepared["w1"], prepared["b1"], prepared["w2"], prepared["b2"],
      prepared["w3"], prepared["b3"], prepared["mask"])

    return out[:B, :A]


def init_params(key, state_dim, action_dim, hidden_dim):
    """PyTorch-Linear-style uniform init: U(-1/sqrt(fan_in), 1/sqrt(fan_in)); weights stored [in, out]."""
    keys = jax.random.split(key, 6)

    def lin(kw, kb, fan_in, fan_out):
        bound = 1.0 / jnp.sqrt(fan_in)
        w = jax.random.uniform(kw, (fan_in, fan_out), jnp.float32, -bound, bound)
        b = jax.random.uniform(kb, (fan_out,), jnp.float32, -bound, bound)
        return w, b

    w1, b1 = lin(keys[0], keys[1], state_dim, hidden_dim)
    w2, b2 = lin(keys[2], keys[3], hidden_dim, hidden_dim)
    w3, b3 = lin(keys[4], keys[5], hidden_dim, action_dim)
    return {"w1": w1, "b1": b1, "w2": w2, "b2": b2, "w3": w3, "b3": b3}


def reference_forward(state, params):
    h = jnp.maximum(state @ params["w1"] + params["b1"], 0.0)
    h = jnp.maximum(h @ params["w2"] + params["b2"], 0.0)
    logits = jnp.maximum(h @ params["w3"] + params["b3"], 0.0)
    return jax.nn.softmax(logits, axis=-1)


if __name__ == "__main__":
    key = jax.random.PRNGKey(0)
    k_param, k_state, k_state2 = jax.random.split(key, 3)

    batch, state_dim, action_dim, hidden_dim = 2, 4, 6, 32
    params = init_params(k_param, state_dim, action_dim, hidden_dim)
    prepared = prepare_actor_params(params)   # padding/casts hoisted: done once

    # Small spec-consistent case.
    state = jax.random.normal(k_state, (batch, state_dim), dtype=jnp.float32)
    out = jax.block_until_ready(actor_forward(state, prepared))
    ref = reference_forward(state, params)
    assert out.shape == (batch, action_dim)
    # bf16 matmuls => loose tolerance vs the f32 reference.
    assert jnp.allclose(out, ref, atol=2e-2, rtol=2e-2), "mismatch vs reference (small)"
    assert jnp.allclose(jnp.sum(out, axis=-1), 1.0, atol=2e-3), "softmax rows must sum to 1"

    # Exercise a multi-step (grid > 1), pipelined launch with a small batch tile.
    state2 = jax.random.normal(k_state2, (32, state_dim), dtype=jnp.float32)
    out2 = jax.block_until_ready(actor_forward(state2, prepared, batch_tile=8))
    ref2 = reference_forward(state2, params)
    assert out2.shape == (32, action_dim)
    assert jnp.allclose(out2, ref2, atol=2e-2, rtol=2e-2), "mismatch vs reference (gridded)"
    assert jnp.allclose(jnp.sum(out2, axis=-1), 1.0, atol=2e-3), "softmax rows must sum to 1"

    print("KERNEL_OK")
</pallas_src>

<mosaic_0001>
module attributes {stable_mosaic.version = 11 : i64} {
  func.func @actor_kernel(%arg0: i32, %arg1: memref<8x4xbf16, #tpu.memory_space<vmem>>, %arg2: memref<4x128xbf16, #tpu.memory_space<vmem>>, %arg3: memref<1x128xf32, #tpu.memory_space<vmem>>, %arg4: memref<128x128xbf16, #tpu.memory_space<vmem>>, %arg5: memref<1x128xf32, #tpu.memory_space<vmem>>, %arg6: memref<128x128xbf16, #tpu.memory_space<vmem>>, %arg7: memref<1x128xf32, #tpu.memory_space<vmem>>, %arg8: memref<1x128xf32, #tpu.memory_space<vmem>>, %arg9: memref<8x128xf32, #tpu.memory_space<vmem>>) attributes {dimension_semantics = [#tpu.dimension_semantics<parallel>], iteration_bounds = array<i64: 1>, scalar_prefetch = 0 : i64, scratch_operands = 0 : i64, tpu.core_type = #tpu.core_type<tc>, window_params = [{transform_indices = @transform_0, window_bounds = array<i64: 8, 4>}, {pipeline_mode = #tpu.pipeline_mode<synchronous>, transform_indices = @transform_1, window_bounds = array<i64: 4, 128>}, {pipeline_mode = #tpu.pipeline_mode<synchronous>, transform_indices = @transform_2, window_bounds = array<i64: 1, 128>}, {pipeline_mode = #tpu.pipeline_mode<synchronous>, transform_indices = @transform_3, window_bounds = array<i64: 128, 128>}, {pipeline_mode = #tpu.pipeline_mode<synchronous>, transform_indices = @transform_4, window_bounds = array<i64: 1, 128>}, {pipeline_mode = #tpu.pipeline_mode<synchronous>, transform_indices = @transform_5, window_bounds = array<i64: 128, 128>}, {pipeline_mode = #tpu.pipeline_mode<synchronous>, transform_indices = @transform_6, window_bounds = array<i64: 1, 128>}, {pipeline_mode = #tpu.pipeline_mode<synchronous>, transform_indices = @transform_7, window_bounds = array<i64: 1, 128>}, {transform_indices = @transform_8, window_bounds = array<i64: 8, 128>}]} {
    %c0 = arith.constant 0 : index
    %c0_0 = arith.constant 0 : index
    %0 = vector.load %arg1[%c0, %c0_0] : memref<8x4xbf16, #tpu.memory_space<vmem>>, vector<8x4xbf16>
    %c0_1 = arith.constant 0 : index
    %c0_2 = arith.constant 0 : index
    %1 = vector.load %arg2[%c0_1, %c0_2] : memref<4x128xbf16, #tpu.memory_space<vmem>>, vector<4x128xbf16>
    %cst = arith.constant dense<0.000000e+00> : vector<8x128xf32>
    %2 = tpu.matmul %0, %1, %cst {dimension_numbers = #tpu.dot_dimension_numbers<[1], [0], [0], [1], [0, 0, 1, 1], [], []>} : vector<8x4xbf16>, vector<4x128xbf16>, vector<8x128xf32> -> vector<8x128xf32>
    %c0_3 = arith.constant 0 : index
    %c0_4 = arith.constant 0 : index
    %3 = vector.load %arg3[%c0_3, %c0_4] : memref<1x128xf32, #tpu.memory_space<vmem>>, vector<1x128xf32>
    %4 = vector.broadcast %3 : vector<1x128xf32> to vector<8x128xf32>
    %5 = arith.addf %2, %4 : vector<8x128xf32>
    %cst_5 = arith.constant 0.000000e+00 : f32
    %6 = vector.broadcast %cst_5 : f32 to vector<8x128xf32>
    %7 = arith.maximumf %5, %6 : vector<8x128xf32>
    %8 = arith.truncf %7 : vector<8x128xf32> to vector<8x128xbf16>
    %c0_6 = arith.constant 0 : index
    %c0_7 = arith.constant 0 : index
    %9 = vector.load %arg4[%c0_6, %c0_7] : memref<128x128xbf16, #tpu.memory_space<vmem>>, vector<128x128xbf16>
    %cst_8 = arith.constant dense<0.000000e+00> : vector<8x128xf32>
    %10 = tpu.matmul %8, %9, %cst_8 {dimension_numbers = #tpu.dot_dimension_numbers<[1], [0], [0], [1], [0, 0, 1, 1], [], []>} : vector<8x128xbf16>, vector<128x128xbf16>, vector<8x128xf32> -> vector<8x128xf32>
    %c0_9 = arith.constant 0 : index
    %c0_10 = arith.constant 0 : index
    %11 = vector.load %arg5[%c0_9, %c0_10] : memref<1x128xf32, #tpu.memory_space<vmem>>, vector<1x128xf32>
    %12 = vector.broadcast %11 : vector<1x128xf32> to vector<8x128xf32>
    %13 = arith.addf %10, %12 : vector<8x128xf32>
    %cst_11 = arith.constant 0.000000e+00 : f32
    %14 = vector.broadcast %cst_11 : f32 to vector<8x128xf32>
    %15 = arith.maximumf %13, %14 : vector<8x128xf32>
    %16 = arith.truncf %15 : vector<8x128xf32> to vector<8x128xbf16>
    %c0_12 = arith.constant 0 : index
    %c0_13 = arith.constant 0 : index
    %17 = vector.load %arg6[%c0_12, %c0_13] : memref<128x128xbf16, #tpu.memory_space<vmem>>, vector<128x128xbf16>
    %cst_14 = arith.constant dense<0.000000e+00> : vector<8x128xf32>
    %18 = tpu.matmul %16, %17, %cst_14 {dimension_numbers = #tpu.dot_dimension_numbers<[1], [0], [0], [1], [0, 0, 1, 1], [], []>} : vector<8x128xbf16>, vector<128x128xbf16>, vector<8x128xf32> -> vector<8x128xf32>
    %c0_15 = arith.constant 0 : index
    %c0_16 = arith.constant 0 : index
    %19 = vector.load %arg7[%c0_15, %c0_16] : memref<1x128xf32, #tpu.memory_space<vmem>>, vector<1x128xf32>
    %20 = vector.broadcast %19 : vector<1x128xf32> to vector<8x128xf32>
    %21 = arith.addf %18, %20 : vector<8x128xf32>
    %cst_17 = arith.constant 0.000000e+00 : f32
    %22 = vector.broadcast %cst_17 : f32 to vector<8x128xf32>
    %23 = arith.maximumf %21, %22 : vector<8x128xf32>
    %c0_18 = arith.constant 0 : index
    %c0_19 = arith.constant 0 : index
    %24 = vector.load %arg8[%c0_18, %c0_19] : memref<1x128xf32, #tpu.memory_space<vmem>>, vector<1x128xf32>
    %25 = vector.broadcast %24 : vector<1x128xf32> to vector<8x128xf32>
    %26 = arith.addf %23, %25 : vector<8x128xf32>
    %cst_20 = arith.constant dense<0xFF800000> : vector<8xf32>
    %27 = vector.multi_reduction <maximumf>, %26, %cst_20 [1] : vector<8x128xf32> to vector<8xf32>
    %28 = vector.shape_cast %27 : vector<8xf32> to vector<8x1xf32>
    %29 = vector.broadcast %28 : vector<8x1xf32> to vector<8x128xf32>
    %30 = arith.subf %26, %29 : vector<8x128xf32>
    %31 = math.exp %30 : vector<8x128xf32>
    %cst_21 = arith.constant dense<0.000000e+00> : vector<8xf32>
    %32 = vector.multi_reduction <add>, %31, %cst_21 [1] : vector<8x128xf32> to vector<8xf32>
    %33 = vector.shape_cast %32 : vector<8xf32> to vector<8x1xf32>
    %34 = vector.broadcast %33 : vector<8x1xf32> to vector<8x128xf32>
    %35 = arith.divf %31, %34 : vector<8x128xf32>
    %c0_22 = arith.constant 0 : index
    %c0_23 = arith.constant 0 : index
    %36 = vector.load %arg9[%c0_22, %c0_23] : memref<8x128xf32, #tpu.memory_space<vmem>>, vector<8x128xf32>
    tpu.vector_store %arg9[%c0_22, %c0_23], %35 {strides = array<i32>} : memref<8x128xf32, #tpu.memory_space<vmem>>, vector<8x128xf32>,
    return
  }
  func.func @transform_0(%arg0: i32) -> (i32, i32) {
    %c0_i32 = arith.constant 0 : i32
    %c0_i32_0 = arith.constant 0 : i32
    return %arg0, %c0_i32 : i32, i32
  }
  func.func @transform_1(%arg0: i32) -> (i32, i32) {
    %c0_i32 = arith.constant 0 : i32
    %c0_i32_0 = arith.constant 0 : i32
    %c0_i32_1 = arith.constant 0 : i32
    return %c0_i32, %c0_i32_0 : i32, i32
  }
  func.func @transform_2(%arg0: i32) -> (i32, i32) {
    %c0_i32 = arith.constant 0 : i32
    %c0_i32_0 = arith.constant 0 : i32
    %c0_i32_1 = arith.constant 0 : i32
    return %c0_i32, %c0_i32_0 : i32, i32
  }
  func.func @transform_3(%arg0: i32) -> (i32, i32) {
    %c0_i32 = arith.constant 0 : i32
    %c0_i32_0 = arith.constant 0 : i32
    %c0_i32_1 = arith.constant 0 : i32
    return %c0_i32, %c0_i32_0 : i32, i32
  }
  func.func @transform_4(%arg0: i32) -> (i32, i32) {
    %c0_i32 = arith.constant 0 : i32
    %c0_i32_0 = arith.constant 0 : i32
    %c0_i32_1 = arith.constant 0 : i32
    return %c0_i32, %c0_i32_0 : i32, i32
  }
  func.func @transform_5(%arg0: i32) -> (i32, i32) {
    %c0_i32 = arith.constant 0 : i32
    %c0_i32_0 = arith.constant 0 : i32
    %c0_i32_1 = arith.constant 0 : i32
    return %c0_i32, %c0_i32_0 : i32, i32
  }
  func.func @transform_6(%arg0: i32) -> (i32, i32) {
    %c0_i32 = arith.constant 0 : i32
    %c0_i32_0 = arith.constant 0 : i32
    %c0_i32_1 = arith.constant 0 : i32
    return %c0_i32, %c0_i32_0 : i32, i32
  }
  func.func @transform_7(%arg0: i32) -> (i32, i32) {
    %c0_i32 = arith.constant 0 : i32
    %c0_i32_0 = arith.constant 0 : i32
    %c0_i32_1 = arith.constant 0 : i32
    return %c0_i32, %c0_i32_0 : i32, i32
  }
  func.func @transform_8(%arg0: i32) -> (i32, i32) {
    %c0_i32 = arith.constant 0 : i32
    %c0_i32_0 = arith.constant 0 : i32
    return %arg0, %c0_i32 : i32, i32
  }
}

</mosaic_0001>

<bundles_post_ra>
// kernel: tpu_custom_call.1
= control target key start
LH: loop header
LB: loop body
LE: loop exit
PB: predicated region body
PF: predicated region fallthrough
CT: control target
= control target key end

     0   :  { %13 = vsyncpa [#allocation3], 0  ;;  %s552_s0 = inlined_call_operand.vmem [shape: bf16[8,4], index: 0, kind: input, shape index: {}]   ;;  %s553_s1 = inlined_call_operand.vmem [shape: bf16[4,128], index: 1, kind: input, shape index: {}]   ;;  %s554_s2 = inlined_call_operand.vmem [shape: f32[1,128], index: 2, kind: input, shape index: {}]   ;;  %s555_s3 = inlined_call_operand.hbm [shape: bf16[128,128], index: 3, kind: input, shape index: {}]   ;;  %s556_s4 = inlined_call_operand.vmem [shape: f32[1,128], index: 4, kind: input, shape index: {}]   ;;  %s557_s5 = inlined_call_operand.hbm [shape: bf16[128,128], index: 5, kind: input, shape index: {}]   ;;  %s558_s6 = inlined_call_operand.vmem [shape: f32[1,128], index: 6, kind: input, shape index: {}]   ;;  %s559_s7 = inlined_call_operand.vmem [shape: f32[1,128], index: 7, kind: input, shape index: {}]   ;;  %s560_s8 = inlined_call_operand.hbm [shape: f32[8,128], index: 8, kind: output, shape index: {}]  }
   0x1   :  { %14 = vsyncpa [#allocation6], 0 }
   0x2   :  { %15 = vsyncpa [#allocation4], 0  ;;  %s26_s29 = sshll.u32 %s555_s3, 4  ;;  %s475_s30 = smov [#allocation2]   ;;  %s27_s29 = int_to_ptr.hbm [resolvable:$true] %s26_s29 }
   0x3   :  { %s28_s9 = sshll.u32 %s475_s30, 4  ;;  %s41_s12 = sshll.u32 %s557_s5, 4  ;;  %s29_s9 = int_to_ptr.vmem [resolvable:$true] %s28_s9  ;;  %s42_s12 = int_to_ptr.hbm [resolvable:$true] %s41_s12 }
   0x4   :  { %s476_s13 = smov 64   ;;  %s477_s14 = smov 4  }
   0x5   :  { %34 = dma.hbm_to_vmem [thread:$0]  %s27_s29, 1024, %s29_s9, [#allocation3], %s476_s13, %s476_s13, %s477_s14  }
   0x6   :  { %s478_s15 = smov [#allocation5]  }
   0x7   :  { %s43_s16 = sshll.u32 %s478_s15, 4  ;;  %s44_s16 = int_to_ptr.vmem [resolvable:$true] %s43_s16 }
   0x8   :  { %49 = dma.hbm_to_vmem [thread:$0]  %s42_s12, 1024, %s44_s16, [#allocation6], %s476_s13, %s476_s13, %s477_s14  }
   0x9   :  { %469 = dma.done.wait [#allocation3], 1024  }
   0xa   :  { %470 = vsyncadd [#allocation3], 4294966272 }
   0xb   :  { %471 = dma.done.wait [#allocation6], 1024  }
   0xc   :  { %472 = vsyncadd [#allocation6], 4294966272  ;;  %vm73_vm0 = vcmask 1041408   ;;  %v64_v0 = vld [vmem:[%s553_s1] sm:$0x3]  ;;  %v375_v1 = vld [vmem:[#allocation2 + $0x38] sm:$0xff] }
   0xd   :  { %v75_v2 = vsel %vm73_vm0, %v64_v0, 0  ;;  %v63_v3 = vld [vmem:[%s552_s0] sm:$0xf]  ;;  %vm69_vm1 = vcmask 31744   ;;  %160 = vmatpush.bf16.msra.mxu1 %v375_v1  ;;  %v374_v4 = vld [vmem:[#allocation2 + $0x30] sm:$0xff]  ;;  %v373_v5 = vld [vmem:[#allocation2 + $0x28] sm:$0xff] }
   0xe   :  { %84 = vmatpush.bf16.msra.mxu0 %v75_v2  ;;  %v372_v6 = vld [vmem:[#allocation2 + $0x20] sm:$0xff]  ;;  %v371_v7 = vld [vmem:[#allocation2 + $0x18] sm:$0xff]  ;;  %v370_v8 = vld [vmem:[#allocation2 + $0x10] sm:$0xff]  ;;  %s292_s25 = sshll.u32 %s560_s8, 4  ;;  %s293_s25 = int_to_ptr.hbm [resolvable:$true] %s292_s25 }
   0xf   :  { %v369_v9 = vld [vmem:[#allocation2 + $0x8] sm:$0xff]  ;;  %v368_v10 = vld [vmem:[#allocation2] sm:$0xff]  ;;  %v383_v11 = vld [vmem:[#allocation5 + $0x38] sm:$0xff] }
  0x10   :  { %243 = vmatpush.bf16.msra.mxu2 %v383_v11  ;;  %v382_v12 = vld [vmem:[#allocation5 + $0x30] sm:$0xff]  ;;  %v381_v13 = vld [vmem:[#allocation5 + $0x28] sm:$0xff]  ;;  %v380_v14 = vld [vmem:[#allocation5 + $0x20] sm:$0xff] }
  0x11   :  { %303 = vmatmul.msk.bf16.vlgmr.msra.gmra.mxu0 %vm69_vm1, %v63_v3  ;;  %161 = vmatpush.bf16.msra.mxu1 %v374_v4  ;;  %v379_v15 = vld [vmem:[#allocation5 + $0x18] sm:$0xff]  ;;  %v378_v16 = vld [vmem:[#allocation5 + $0x10] sm:$0xff]  ;;  %v389_v17 = vld [vmem:[%s554_s2] ss:$0 sm:$0xff] }
  0x12   :  { %v377_v23 = vld [vmem:[#allocation5 + $0x8] sm:$0xff]  ;;  %v376_v24 = vld [vmem:[#allocation5] sm:$0xff] }
  0x13   :  { %v390_v25 = vld [vmem:[%s556_s4] ss:$0 sm:$0xff]  ;;  %s479_s4 = smov [#allocation7]  }
  0x14   :  { %244 = vmatpush.bf16.msra.mxu2 %v382_v12  ;;  %v391_v31 = vld [vmem:[%s558_s6] ss:$0 sm:$0xff]  ;;  %s290_s6 = sshll.u32 %s479_s4, 4  ;;  %s291_s6 = int_to_ptr.vmem [resolvable:$true] %s290_s6 }
  0x15   :  { %162 = vmatpush.bf16.msra.mxu1 %v373_v5  ;;  %v392_v34 = vld [vmem:[%s559_s7] ss:$0 sm:$0xff] }
  0x18   :  { %245 = vmatpush.bf16.msra.mxu2 %v381_v13 }
  0x19   :  { %163 = vmatpush.bf16.msra.mxu1 %v372_v6 }
  0x1c   :  { %246 = vmatpush.bf16.msra.mxu2 %v380_v14 }
  0x1d   :  { %164 = vmatpush.bf16.msra.mxu1 %v371_v7 }
  0x20   :  { %247 = vmatpush.bf16.msra.mxu2 %v379_v15 }
  0x21   :  { %165 = vmatpush.bf16.msra.mxu1 %v370_v8 }
  0x24   :  { %248 = vmatpush.bf16.msra.mxu2 %v378_v16 }
  0x25   :  { %166 = vmatpush.bf16.msra.mxu1 %v369_v9 }
  0x28   :  { %249 = vmatpush.bf16.msra.mxu2 %v377_v23 }
  0x29   :  { %167 = vmatpush.bf16.msra.mxu1 %v368_v10 }
  0x2c   :  { %250 = vmatpush.bf16.msra.mxu2 %v376_v24 }
  0x8e   :  { %v86_v18 = vpop.f32.mrf.mxu0 }
  0x8f   :  { %v87_v19 = vadd.f32 %v389_v17, %v86_v18 }
  0x91   :  { %v90_v20 = vmax.f32 %v87_v19, 0.0 }
  0x93   :  { %v91_v21 = vpack.c.bf16 %v90_v20, %v90_v20 }
  0x95   :  { %168 = vmatmul.bf16.vlgmr.msra.gmra.mxu1 %v91_v21 }
  0x96   :  { %v88_v22 = vpop.f32.mrf.mxu0 }
 0x112   :  { %v169_v26 = vpop.f32.mrf.mxu1 }
 0x113   :  { %v170_v27 = vadd.f32 %v390_v25, %v169_v26 }
 0x115   :  { %v173_v28 = vmax.f32 %v170_v27, 0.0 }
 0x117   :  { %v174_v29 = vpack.c.bf16 %v173_v28, %v173_v28 }
 0x119   :  { %251 = vmatmul.bf16.vlgmr.msra.gmra.mxu2 %v174_v29 }
 0x11a   :  { %v171_v30 = vpop.f32.mrf.mxu1 }
 0x19c   :  { %v252_v32 = vpop.f32.mrf.mxu2 }
 0x19d   :  { %v253_v33 = vadd.f32 %v391_v31, %v252_v32 }
 0x19f   :  { %v256_v35 = vmax.f32 %v253_v33, 0.0 }
 0x1a1   :  { %v261_v36 = vadd.f32 %v392_v34, %v256_v35 }
 0x1a3   :  { %262 = vmax.xlane.f32.xlu0 %v261_v36 }
 0x1a4   :  { %v254_v37 = vpop.f32.mrf.mxu2 }
 0x216   :  { %v263_v38 = vpop.xlane.xlu0 %262 }
 0x217   :  { %v264_v39 = vsub.f32 %v261_v36, %v263_v38 }
 0x219   :  { %v265_v40 = vmul.f32 1.442695, %v264_v39 }
 0x21b   :  { %393 = vpow2.f32 %v265_v40 }
 0x221   :  { %v394_v41 = vpop.eup %393 }
 0x222   :  { %267 = vadd.xlane.f32.xlu0 %v394_v41 }
 0x295   :  { %v268_v42 = vpop.xlane.xlu0 %267 }
 0x296   :  { %395 = vrcp.f32 %v268_v42  ;;  %v280_v46 = vand.u32 2147483648, %v268_v42  ;;  %v278_v48 = vand.u32 2147483647, %v268_v42  ;;  %vm274_vm3 = vweird.f32 %v268_v42 }
 0x298   :  { %v281_v50 = vor.u32 1.1754944e-38, %v280_v46  ;;  %vm279_vm5 = vcmp.eq.f32.partialorder %v278_v48, 8.507059e+37 }
 0x29c   :  { %v396_v43 = vpop.eup %395 }
 0x29d   :  { %v270_v44 = vmul.f32 %v396_v43, %v268_v42  ;;  %vm275_vm2 = vweird.f32 %v396_v43 }
 0x29e   :  { %vm276_vm4 = vmor %vm274_vm3, %vm275_vm2 }
 0x29f   :  { %v271_v45 = vsub.f32 1.0, %v270_v44 }
 0x2a1   :  { %v272_v47 = vmul.f32 %v396_v43, %v271_v45 }
 0x2a3   :  { %v273_v49 = vadd.f32 %v396_v43, %v272_v47 }
 0x2a5   :  { %v277_v51 = vsel %vm276_vm4, %v396_v43, %v273_v49 }
 0x2a6   :  { %v282_v52 = vsel %vm279_vm5, %v281_v50, %v277_v51 }
 0x2a7   :  { %v283_v53 = vmul.f32 %v394_v41, %v282_v52 }
 0x2a9   :  { %284 = vst [vmem:[#allocation7] sm:$0xff] %v283_v53 }
 0x2aa   :  { %295 = dma.vmem_to_hbm [thread:$0]  %s291_s6, 128, %s293_s25, [#allocation4]  }
 0x2ab   :  { %473 = dma.done.wait [#allocation4], 128  }
 0x2ac   :  { %474 = vsyncadd [#allocation4], 4294967168 }
 0x2ad   :  { %300 = vsyncpa [#allocation3], 1 }
 0x2ae   :  { %301 = vsyncpa [#allocation6], 1 }
 0x2af   :  { %302 = vsyncpa [#allocation4], 1 }

</bundles_post_ra>
